<compile_context>
chip_gen: v7x
topology: tpu7x:2x2x1
jax: 0.10.0
libtpu: 0.0.40
codegen_flags: <defaults>
</compile_context>

<pallas_src>
import numpy as np
import jax
import jax.numpy as jnp
from jax.experimental import pallas as pl
from jax.experimental.pallas import tpu as pltpu

# ---------------- configuration (small synthetic shapes) ----------------
B = 2                        # batch
N_FFT = 16
HOP = 8
WIN = 16
COMPRESS = 0.3               # compress_factor
F_BINS = N_FFT // 2 + 1      # 9 one-sided freq bins
T_FRAMES = 8                 # stft frames per segment ("segment_stft")
TF = F_BINS * T_FRAMES       # 72 lanes: (f, t) flattened, f-major
SEG_SIZE = (T_FRAMES - 1) * HOP          # 56 audio samples per segment (center=True)
N_SEG = 3                    # number of segments
AUDIO_LEN = 128              # total audio length
LAST_SEG = AUDIO_LEN % SEG_SIZE          # 16 (non-zero, as the module requires)
L_FULL = N_FFT + (T_FRAMES - 1) * HOP    # 72 = OLA length before center-trim
SELD_FRAME = 8               # seld_net frame length
SELD_T = AUDIO_LEN // SELD_FRAME         # 16 time steps for timewise_distance
SELD_H = 16                  # seld_net hidden width
NB = N_SEG * B               # 6 rows processed at once


# =========================== fused Pallas kernel ===========================

def _joint_kernel(mag_ref, pha_ref, norm_ref,
                  wm_ref, bm_ref, wp_ref, bp_ref,
                  mcos_ref, msin_ref,
                  w1_ref, b1_ref, w2_ref, b2_ref,
                  spec_ref, seg_ref, audio_ref, head_ref):
    # mag/pha: (NB, TF) rows = (segment, batch), lanes = (freq, frame)
    mag = mag_ref[...]
    pha = pha_ref[...]

    # ---- generator: two block-diagonal matmuls (mag branch, pha branch) ----
    lin_m = jnp.dot(mag, wm_ref[...],
                    preferred_element_type=jnp.float32) + bm_ref[...]
    lin_p = jnp.dot(pha, wp_ref[...],
                    preferred_element_type=jnp.float32) + bp_ref[...]
    mask = pl.reciprocal(1.0 + jnp.exp(-lin_m), approx=True)      # sigmoid (EUP)
    dmag = mag * mask                                             # compressed mag
    dpha = pha + jnp.tanh(lin_p)

    cosp = jnp.cos(dpha)                                          # computed once,
    sinp = jnp.sin(dpha)                                          # reused below
    cre = dmag * cosp                                             # complex spectrum from
    cim = dmag * sinp                                             # the COMPRESSED mag

    # packed lane-dense spectrum output: [dmag | dpha | com_re | com_im]
    spec_ref[...] = jnp.concatenate([dmag, dpha, cre, cim], axis=-1)

    # ---- mag_phase_istft: decompress, then two accumulating matmuls against
    #      constant bases folding IDFT * window * overlap-add * 1/env * trim.
    mag_dec = jnp.exp(jnp.log(jnp.maximum(dmag, 1e-12)) * (1.0 / COMPRESS))
    seg_audio = (
        jnp.dot(mag_dec * cosp, mcos_ref[...], preferred_element_type=jnp.float32)
        + jnp.dot(mag_dec * sinp, msin_ref[...], preferred_element_type=jnp.float32)
    )                                                             # (NB, SEG_SIZE)
    seg_ref[...] = seg_audio

    # ---- concat segments: full segments + last `AUDIO_LEN % SEG_SIZE` samples
    #      of the final segment (matches audio_g[:, -last_segment_length:]).
    pieces = [seg_audio[s * B:(s + 1) * B, :] for s in range(N_SEG - 1)]
    pieces.append(seg_audio[(N_SEG - 1) * B:N_SEG * B, SEG_SIZE - LAST_SEG:])
    audio_g = jnp.concatenate(pieces, axis=-1) * (1.0 / norm_ref[0])  # (B, 128)
    audio_ref[...] = audio_g

    # ---- seld head: framing + frame-MLP + per-frame reduce + global mean as
    #      two block-diagonal matmuls (MXU); mean column appended to w2.
    h = jnp.maximum(
        jnp.dot(audio_g, w1_ref[...], preferred_element_type=jnp.float32)
        + b1_ref[...], 0.0)                                       # (B, SELD_T*SELD_H)
    head_ref[...] = (jnp.dot(h, w2_ref[...],
                             preferred_element_type=jnp.float32)
                     + b2_ref[...])                               # (B, SELD_T + 1)


def fused_forward(mag72, pha72, norm_factor, fused):
    vmem = pl.BlockSpec(memory_space=pltpu.MemorySpace.VMEM)
    smem = pl.BlockSpec(memory_space=pltpu.MemorySpace.SMEM)
    out_shapes = (
        jax.ShapeDtypeStruct((NB, 4 * TF), jnp.float32),      # [dmag|dpha|re|im]
        jax.ShapeDtypeStruct((NB, SEG_SIZE), jnp.float32),    # per-segment audio
        jax.ShapeDtypeStruct((B, AUDIO_LEN), jnp.float32),    # normalized audio_g
        jax.ShapeDtypeStruct((B, SELD_T + 1), jnp.float32),   # [timewise | distance]
    )
    return pl.pallas_call(
        _joint_kernel,
        out_shape=out_shapes,
        in_specs=[vmem, vmem, smem] + [vmem] * 10,
        out_specs=(vmem,) * 4,
    )(mag72, pha72, norm_factor,
      fused["wm_big"], fused["bm_big"], fused["wp_big"], fused["bp_big"],
      fused["istft_Mcos"], fused["istft_Msin"],
      fused["w1_big"], fused["b1_big"], fused["w2_ext"], fused["b2"])


# =========================== constants / params ===========================

def _make_istft_basis():
    """(2*TF, SEG_SIZE) matrix folding IDFT basis, synthesis window,
    overlap-add scatter, 1/window-envelope and center trim into one matmul."""
    n = np.arange(N_FFT)
    k = np.arange(F_BINS)
    win = 0.5 * (1.0 - np.cos(2.0 * np.pi * np.arange(WIN) / WIN))   # periodic Hann
    wk = np.full((F_BINS,), 2.0)
    wk[0] = 1.0
    wk[-1] = 1.0                                                     # DC / Nyquist
    ang = 2.0 * np.pi * np.outer(k, n) / N_FFT                       # (F, N_FFT)
    basis_cos = (wk[:, None] * np.cos(ang) / N_FFT) * win[None, :]
    basis_sin = (wk[:, None] * np.sin(ang) / N_FFT) * win[None, :]
    env = np.zeros((L_FULL,))
    for t in range(T_FRAMES):
        env[t * HOP: t * HOP + N_FFT] += win ** 2
    # NOLA check for the kept (center-trimmed) region.
    assert np.all(env[N_FFT // 2: N_FFT // 2 + SEG_SIZE] > 1e-8)
    inv_env = 1.0 / np.maximum(env, 1e-8)

    M = np.zeros((2 * TF, SEG_SIZE), np.float32)
    for t in range(T_FRAMES):
        for c in range(SEG_SIZE):
            l = c + N_FFT // 2                    # position in full OLA buffer
            j = l - t * HOP                       # position inside frame t
            if 0 <= j < N_FFT:
                M[k * T_FRAMES + t, c] = basis_cos[:, j] * inv_env[l]
                M[TF + k * T_FRAMES + t, c] = -basis_sin[:, j] * inv_env[l]
    return jnp.asarray(M, jnp.float32)


def init_params():
    key = jax.random.PRNGKey(0)
    ks = jax.random.split(key, 8)
    return {
        "w_mag": 0.3 * jax.random.normal(ks[0], (F_BINS, F_BINS), jnp.float32),
        "b_mag": 0.1 * jax.random.normal(ks[1], (1, F_BINS), jnp.float32),
        "w_pha": 0.3 * jax.random.normal(ks[2], (F_BINS, F_BINS), jnp.float32),
        "b_pha": 0.1 * jax.random.normal(ks[3], (1, F_BINS), jnp.float32),
        "w1": 0.3 * jax.random.normal(ks[4], (SELD_FRAME, SELD_H), jnp.float32),
        "b1": 0.1 * jax.random.normal(ks[5], (1, SELD_H), jnp.float32),
        "w2": 0.3 * jax.random.normal(ks[6], (1, SELD_H), jnp.float32),
        "b2": 0.1 * jax.random.normal(ks[7], (1, 1), jnp.float32),
    }


def prepare_fused_params(params):
    """Precompute the block-structured weights used by the fused kernel."""
    eye_t = jnp.eye(T_FRAMES, dtype=jnp.float32)
    wm_big = jnp.kron(params["w_mag"], eye_t)                  # (TF, TF)
    wp_big = jnp.kron(params["w_pha"], eye_t)                  # (TF, TF)
    bm_big = jnp.repeat(params["b_mag"][0], T_FRAMES)[None, :]  # (1, TF)
    bp_big = jnp.repeat(params["b_pha"][0], T_FRAMES)[None, :]  # (1, TF)

    M = _make_istft_basis()                                    # (2*TF, SEG_SIZE)
    istft_Mcos = M[:TF, :]
    istft_Msin = M[TF:, :]

    eye_s = jnp.eye(SELD_T, dtype=jnp.float32)
    w1_big = jnp.kron(eye_s, params["w1"])                     # (AUDIO_LEN, SELD_T*SELD_H)
    b1_big = jnp.tile(params["b1"][0], SELD_T)[None, :]        # (1, SELD_T*SELD_H)
    w2_big = jnp.kron(eye_s, params["w2"].reshape(SELD_H, 1))  # (SELD_T*SELD_H, SELD_T)
    # append mean-over-time column -> distance comes out of the same matmul
    w2_ext = jnp.concatenate(
        [w2_big, jnp.mean(w2_big, axis=1, keepdims=True)], axis=1)  # (.., SELD_T+1)

    return {"wm_big": wm_big, "bm_big": bm_big,
            "wp_big": wp_big, "bp_big": bp_big,
            "istft_Mcos": istft_Mcos, "istft_Msin": istft_Msin,
            "w1_big": w1_big, "b1_big": b1_big,
            "w2_ext": w2_ext, "b2": params["b2"]}


# ================= forward (wrapper glue = free reshapes / slices) =================

def joint_model_forward(noisy_mag_segments, noisy_pha_segments, norm_factor, fused):
    # torch layout (N, B, F, T) viewed as (N*B, F*T): contiguous, zero transposes.
    mag72 = jnp.stack(noisy_mag_segments, axis=0).reshape(NB, TF)
    pha72 = jnp.stack(noisy_pha_segments, axis=0).reshape(NB, TF)

    spec, seg_audio, audio_g, head = fused_forward(mag72, pha72, norm_factor, fused)

    dmag_bft = spec[:, 0 * TF:1 * TF].reshape(N_SEG, B, F_BINS, T_FRAMES)
    dpha_bft = spec[:, 1 * TF:2 * TF].reshape(N_SEG, B, F_BINS, T_FRAMES)
    dcom_bft = jnp.stack(
        [spec[:, 2 * TF:3 * TF].reshape(N_SEG, B, F_BINS, T_FRAMES),
         spec[:, 3 * TF:4 * TF].reshape(N_SEG, B, F_BINS, T_FRAMES)], axis=-1)
    seg_audio_nbs = seg_audio.reshape(N_SEG, B, SEG_SIZE)      # pre-normalization audio

    denoised_segments = [seg_audio_nbs[i] for i in range(N_SEG)]
    denoised_mag_segments = [dmag_bft[i] for i in range(N_SEG)]
    denoised_pha_segments = [dpha_bft[i] for i in range(N_SEG)]
    denoised_com_segments = [dcom_bft[i] for i in range(N_SEG)]

    timewise_distance = head[:, :SELD_T]                       # (B, SELD_T)
    distance = head[:, SELD_T:]                                # (B, 1)

    # TODO(synk): discriminator is held by the module but unused in forward().
    return (audio_g, denoised_segments, denoised_mag_segments,
            denoised_pha_segments, denoised_com_segments,
            timewise_distance, distance)


if __name__ == "__main__":
    key = jax.random.PRNGKey(0)
    kmag, kpha = jax.random.split(key)
    noisy_mag_segments = []
    noisy_pha_segments = []
    for i in range(N_SEG):
        km = jax.random.fold_in(kmag, i)
        kp = jax.random.fold_in(kpha, i)
        # compressed magnitudes (positive) and phases in (-pi, pi), torch layout (B, F, T)
        noisy_mag_segments.append(
            jnp.abs(jax.random.normal(km, (B, F_BINS, T_FRAMES), jnp.float32)))
        noisy_pha_segments.append(
            jax.random.uniform(kp, (B, F_BINS, T_FRAMES), jnp.float32,
                               minval=-jnp.pi, maxval=jnp.pi))
    norm_factor = jnp.array([2.0], dtype=jnp.float32)

    params = init_params()
    fused = prepare_fused_params(params)

    forward = jax.jit(joint_model_forward)
    out = forward(noisy_mag_segments, noisy_pha_segments, norm_factor, fused)
    jax.block_until_ready(out)
    print("KERNEL_OK")
</pallas_src>

<mosaic_0001>
module attributes {stable_mosaic.version = 11 : i64} {
  func.func @_joint_kernel(%arg0: memref<6x72xf32, #tpu.memory_space<vmem>>, %arg1: memref<6x72xf32, #tpu.memory_space<vmem>>, %arg2: memref<1xf32, #tpu.memory_space<smem>>, %arg3: memref<72x72xf32, #tpu.memory_space<vmem>>, %arg4: memref<1x72xf32, #tpu.memory_space<vmem>>, %arg5: memref<72x72xf32, #tpu.memory_space<vmem>>, %arg6: memref<1x72xf32, #tpu.memory_space<vmem>>, %arg7: memref<72x56xf32, #tpu.memory_space<vmem>>, %arg8: memref<72x56xf32, #tpu.memory_space<vmem>>, %arg9: memref<128x256xf32, #tpu.memory_space<vmem>>, %arg10: memref<1x256xf32, #tpu.memory_space<vmem>>, %arg11: memref<256x17xf32, #tpu.memory_space<vmem>>, %arg12: memref<1x1xf32, #tpu.memory_space<vmem>>, %arg13: memref<6x288xf32, #tpu.memory_space<vmem>>, %arg14: memref<6x56xf32, #tpu.memory_space<vmem>>, %arg15: memref<2x128xf32, #tpu.memory_space<vmem>>, %arg16: memref<2x17xf32, #tpu.memory_space<vmem>>) attributes {dimension_semantics = [], scalar_prefetch = 0 : i64, scratch_operands = 0 : i64, tpu.core_type = #tpu.core_type<tc>} {
    %c0 = arith.constant 0 : index
    %c0_0 = arith.constant 0 : index
    %0 = vector.load %arg0[%c0, %c0_0] : memref<6x72xf32, #tpu.memory_space<vmem>>, vector<6x72xf32>
    %c0_1 = arith.constant 0 : index
    %c0_2 = arith.constant 0 : index
    %1 = vector.load %arg1[%c0_1, %c0_2] : memref<6x72xf32, #tpu.memory_space<vmem>>, vector<6x72xf32>
    %c0_3 = arith.constant 0 : index
    %c0_4 = arith.constant 0 : index
    %2 = vector.load %arg3[%c0_3, %c0_4] : memref<72x72xf32, #tpu.memory_space<vmem>>, vector<72x72xf32>
    %cst = arith.constant dense<0.000000e+00> : vector<6x72xf32>
    %3 = tpu.matmul %0, %2, %cst {dimension_numbers = #tpu.dot_dimension_numbers<[1], [0], [0], [1], [0, 0, 1, 1], [], []>} : vector<6x72xf32>, vector<72x72xf32>, vector<6x72xf32> -> vector<6x72xf32>
    %c0_5 = arith.constant 0 : index
    %c0_6 = arith.constant 0 : index
    %4 = vector.load %arg4[%c0_5, %c0_6] : memref<1x72xf32, #tpu.memory_space<vmem>>, vector<1x72xf32>
    %5 = vector.broadcast %4 : vector<1x72xf32> to vector<6x72xf32>
    %6 = arith.addf %3, %5 : vector<6x72xf32>
    %c0_7 = arith.constant 0 : index
    %c0_8 = arith.constant 0 : index
    %7 = vector.load %arg5[%c0_7, %c0_8] : memref<72x72xf32, #tpu.memory_space<vmem>>, vector<72x72xf32>
    %cst_9 = arith.constant dense<0.000000e+00> : vector<6x72xf32>
    %8 = tpu.matmul %1, %7, %cst_9 {dimension_numbers = #tpu.dot_dimension_numbers<[1], [0], [0], [1], [0, 0, 1, 1], [], []>} : vector<6x72xf32>, vector<72x72xf32>, vector<6x72xf32> -> vector<6x72xf32>
    %c0_10 = arith.constant 0 : index
    %c0_11 = arith.constant 0 : index
    %9 = vector.load %arg6[%c0_10, %c0_11] : memref<1x72xf32, #tpu.memory_space<vmem>>, vector<1x72xf32>
    %10 = vector.broadcast %9 : vector<1x72xf32> to vector<6x72xf32>
    %11 = arith.addf %8, %10 : vector<6x72xf32>
    %cst_12 = arith.constant 0.000000e+00 : f32
    %12 = vector.broadcast %cst_12 : f32 to vector<6x72xf32>
    %13 = arith.subf %12, %6 : vector<6x72xf32>
    %14 = math.exp %13 : vector<6x72xf32>
    %cst_13 = arith.constant 1.000000e+00 : f32
    %15 = vector.broadcast %cst_13 : f32 to vector<6x72xf32>
    %16 = arith.addf %15, %14 : vector<6x72xf32>
    %17 = tpu.reciprocal %16 {approx = true} : vector<6x72xf32> -> vector<6x72xf32>
    %18 = arith.mulf %0, %17 : vector<6x72xf32>
    %19 = math.tanh %11 : vector<6x72xf32>
    %20 = arith.addf %1, %19 : vector<6x72xf32>
    %21 = math.cos %20 : vector<6x72xf32>
    %22 = math.sin %20 : vector<6x72xf32>
    %23 = arith.mulf %18, %21 : vector<6x72xf32>
    %24 = arith.mulf %18, %22 : vector<6x72xf32>
    %25 = tpu.concatenate %18, %20, %23, %24 in 1 : vector<6x72xf32>, vector<6x72xf32>, vector<6x72xf32>, vector<6x72xf32> -> vector<6x288xf32>
    %c0_14 = arith.constant 0 : index
    %c0_15 = arith.constant 0 : index
    %26 = vector.load %arg13[%c0_14, %c0_15] : memref<6x288xf32, #tpu.memory_space<vmem>>, vector<6x288xf32>
    tpu.vector_store %arg13[%c0_14, %c0_15], %25 {strides = array<i32>} : memref<6x288xf32, #tpu.memory_space<vmem>>, vector<6x288xf32>,
    %cst_16 = arith.constant 9.99999996E-13 : f32
    %27 = vector.broadcast %cst_16 : f32 to vector<6x72xf32>
    %28 = arith.maximumf %18, %27 : vector<6x72xf32>
    %29 = math.log %28 : vector<6x72xf32>
    %cst_17 = arith.constant 3.33333325 : f32
    %30 = vector.broadcast %cst_17 : f32 to vector<6x72xf32>
    %31 = arith.mulf %29, %30 : vector<6x72xf32>
    %32 = math.exp %31 : vector<6x72xf32>
    %33 = arith.mulf %32, %21 : vector<6x72xf32>
    %c0_18 = arith.constant 0 : index
    %c0_19 = arith.constant 0 : index
    %34 = vector.load %arg7[%c0_18, %c0_19] : memref<72x56xf32, #tpu.memory_space<vmem>>, vector<72x56xf32>
    %cst_20 = arith.constant dense<0.000000e+00> : vector<6x56xf32>
    %35 = tpu.matmul %33, %34, %cst_20 {dimension_numbers = #tpu.dot_dimension_numbers<[1], [0], [0], [1], [0, 0, 1, 1], [], []>} : vector<6x72xf32>, vector<72x56xf32>, vector<6x56xf32> -> vector<6x56xf32>
    %36 = arith.mulf %32, %22 : vector<6x72xf32>
    %c0_21 = arith.constant 0 : index
    %c0_22 = arith.constant 0 : index
    %37 = vector.load %arg8[%c0_21, %c0_22] : memref<72x56xf32, #tpu.memory_space<vmem>>, vector<72x56xf32>
    %cst_23 = arith.constant dense<0.000000e+00> : vector<6x56xf32>
    %38 = tpu.matmul %36, %37, %cst_23 {dimension_numbers = #tpu.dot_dimension_numbers<[1], [0], [0], [1], [0, 0, 1, 1], [], []>} : vector<6x72xf32>, vector<72x56xf32>, vector<6x56xf32> -> vector<6x56xf32>
    %39 = arith.addf %35, %38 : vector<6x56xf32>
    %c0_24 = arith.constant 0 : index
    %c0_25 = arith.constant 0 : index
    %40 = vector.load %arg14[%c0_24, %c0_25] : memref<6x56xf32, #tpu.memory_space<vmem>>, vector<6x56xf32>
    tpu.vector_store %arg14[%c0_24, %c0_25], %39 {strides = array<i32>} : memref<6x56xf32, #tpu.memory_space<vmem>>, vector<6x56xf32>,
    %41 = vector.extract_strided_slice %39 {offsets = [0, 0], sizes = [2, 56], strides = [1, 1]} : vector<6x56xf32> to vector<2x56xf32>
    %42 = vector.extract_strided_slice %39 {offsets = [2, 0], sizes = [2, 56], strides = [1, 1]} : vector<6x56xf32> to vector<2x56xf32>
    %43 = vector.extract_strided_slice %39 {offsets = [4, 40], sizes = [2, 16], strides = [1, 1]} : vector<6x56xf32> to vector<2x16xf32>
    %44 = tpu.concatenate %41, %42, %43 in 1 : vector<2x56xf32>, vector<2x56xf32>, vector<2x16xf32> -> vector<2x128xf32>
    %c0_26 = arith.constant 0 : index
    %45 = memref.load %arg2[%c0_26] : memref<1xf32, #tpu.memory_space<smem>>
    %cst_27 = arith.constant 1.000000e+00 : f32
    %46 = arith.divf %cst_27, %45 : f32
    %47 = vector.broadcast %46 : f32 to vector<2x128xf32>
    %48 = arith.mulf %44, %47 : vector<2x128xf32>
    %c0_28 = arith.constant 0 : index
    %c0_29 = arith.constant 0 : index
    %49 = vector.load %arg15[%c0_28, %c0_29] : memref<2x128xf32, #tpu.memory_space<vmem>>, vector<2x128xf32>
    tpu.vector_store %arg15[%c0_28, %c0_29], %48 {strides = array<i32>} : memref<2x128xf32, #tpu.memory_space<vmem>>, vector<2x128xf32>,
    %c0_30 = arith.constant 0 : index
    %c0_31 = arith.constant 0 : index
    %50 = vector.load %arg9[%c0_30, %c0_31] : memref<128x256xf32, #tpu.memory_space<vmem>>, vector<128x256xf32>
    %cst_32 = arith.constant dense<0.000000e+00> : vector<2x256xf32>
    %51 = tpu.matmul %48, %50, %cst_32 {dimension_numbers = #tpu.dot_dimension_numbers<[1], [0], [0], [1], [0, 0, 1, 1], [], []>} : vector<2x128xf32>, vector<128x256xf32>, vector<2x256xf32> -> vector<2x256xf32>
    %c0_33 = arith.constant 0 : index
    %c0_34 = arith.constant 0 : index
    %52 = vector.load %arg10[%c0_33, %c0_34] : memref<1x256xf32, #tpu.memory_space<vmem>>, vector<1x256xf32>
    %53 = vector.broadcast %52 : vector<1x256xf32> to vector<2x256xf32>
    %54 = arith.addf %51, %53 : vector<2x256xf32>
    %cst_35 = arith.constant 0.000000e+00 : f32
    %55 = vector.broadcast %cst_35 : f32 to vector<2x256xf32>
    %56 = arith.maximumf %54, %55 : vector<2x256xf32>
    %c0_36 = arith.constant 0 : index
    %c0_37 = arith.constant 0 : index
    %57 = vector.load %arg11[%c0_36, %c0_37] : memref<256x17xf32, #tpu.memory_space<vmem>>, vector<256x17xf32>
    %cst_38 = arith.constant dense<0.000000e+00> : vector<2x17xf32>
    %58 = tpu.matmul %56, %57, %cst_38 {dimension_numbers = #tpu.dot_dimension_numbers<[1], [0], [0], [1], [0, 0, 1, 1], [], []>} : vector<2x256xf32>, vector<256x17xf32>, vector<2x17xf32> -> vector<2x17xf32>
    %c0_39 = arith.constant 0 : index
    %c0_40 = arith.constant 0 : index
    %59 = vector.load %arg12[%c0_39, %c0_40] : memref<1x1xf32, #tpu.memory_space<vmem>>, vector<1x1xf32>
    %60 = vector.broadcast %59 : vector<1x1xf32> to vector<2x17xf32>
    %61 = arith.addf %58, %60 : vector<2x17xf32>
    %c0_41 = arith.constant 0 : index
    %c0_42 = arith.constant 0 : index
    %62 = vector.load %arg16[%c0_41, %c0_42] : memref<2x17xf32, #tpu.memory_space<vmem>>, vector<2x17xf32>
    tpu.vector_store %arg16[%c0_41, %c0_42], %61 {strides = array<i32>} : memref<2x17xf32, #tpu.memory_space<vmem>>, vector<2x17xf32>,
    return
  }
}

</mosaic_0001>

<bundles_post_ra>
// kernel: squeeze.15
= control target key start
LH: loop header
LB: loop body
LE: loop exit
PB: predicated region body
PF: predicated region fallthrough
CT: control target
= control target key end

     0   :  { %s74_s8 = smov 120   ;;  %vm7_vm0 = vcmask 64512   ;;  %s75_s11 = smov 96   ;;  %s130_s0 = inlined_call_operand.vmem [shape: f32[2,72], index: 0, kind: input, shape index: {}]   ;;  %s131_s1 = inlined_call_operand.vmem [shape: f32[2,9,8], index: 1, kind: output, shape index: {}]  }
   0x1   :  { %v4_v0 = vld [vmem:[%s130_s0] sm:$0x3]  ;;  %s73_s0 = smov 104   ;;  %s76_s12 = smov 112  }
   0x2   :  { %5 = vst [vmem:[#allocation0] sm:$0x3] %v4_v0  ;;  %s77_s13 = smov 80   ;;  %s78_s14 = smov 88  }
   0x3   :  { %s79_s15 = smov 64   ;;  %s80_s16 = smov 72  }
   0x9   :  { %v21_v1 = vld [vmem:[#allocation0] sm:$0x3]  }
   0xa   :  { %v9_v2 = vld [vmem:[#allocation0] sm:$0x3]   ;;  %22 = vrot.lane.b32.xlu1 %v21_v1, %s73_s0 }
   0xb   :  { %10 = vrot.lane.b32.xlu0 %v9_v2, %s74_s8  ;;  %v27_v3 = vld [vmem:[#allocation0] sm:$0x3]  }
   0xc   :  { %v15_v4 = vld [vmem:[#allocation0] sm:$0x3]  }
   0xd   :  { %v6_v5 = vld [vmem:[#allocation0] sm:$0x3]  }
   0xe   :  { %8 = vst.msk [vmem:[%s131_s1] ss:$16 sm:$0x3] %vm7_vm0, %v6_v5   ;;  %28 = vrot.lane.b32.xlu1 %v27_v3, %s75_s11  ;;  %v39_v6 = vld [vmem:[#allocation0] sm:$0x3]  }
   0xf   :  { %16 = vrot.lane.b32.xlu0 %v15_v4, %s76_s12  ;;  %v33_v7 = vld [vmem:[#allocation0] sm:$0x3]  }
  0x10   :  { %v51_v8 = vld [vmem:[#allocation0] sm:$0x3]  }
  0x11   :  { %v45_v9 = vld [vmem:[#allocation0] sm:$0x3]  }
  0x12   :  { %40 = vrot.lane.b32.xlu1 %v39_v6, %s77_s13 }
  0x13   :  { %34 = vrot.lane.b32.xlu0 %v33_v7, %s78_s14 }
  0x16   :  { %52 = vrot.lane.b32.xlu1 %v51_v8, %s79_s15 }
  0x17   :  { %46 = vrot.lane.b32.xlu0 %v45_v9, %s80_s16 }
  0x7c   :  { %v23_v10 = vpop.permute.xlu1 %22  }
  0x7d   :  { %v11_v11 = vpop.permute.xlu0 %10   ;;  %59 = vst.msk [vmem:[%s131_s1 + $0x3] ss:$16 sm:$0x3] %vm7_vm0, %v23_v10  }
  0x7e   :  { %57 = vst.msk [vmem:[%s131_s1 + $0x1] ss:$16 sm:$0x3] %vm7_vm0, %v11_v11  }
  0x80   :  { %v29_v12 = vpop.permute.xlu1 %28  }
  0x81   :  { %v17_v13 = vpop.permute.xlu0 %16   ;;  %60 = vst.msk [vmem:[%s131_s1 + $0x4] ss:$16 sm:$0x3] %vm7_vm0, %v29_v12  }
  0x82   :  { %58 = vst.msk [vmem:[%s131_s1 + $0x2] ss:$16 sm:$0x3] %vm7_vm0, %v17_v13  }
  0x84   :  { %v41_v14 = vpop.permute.xlu1 %40  }
  0x85   :  { %v35_v15 = vpop.permute.xlu0 %34   ;;  %62 = vst.msk [vmem:[%s131_s1 + $0x6] ss:$16 sm:$0x3] %vm7_vm0, %v41_v14  }
  0x86   :  { %61 = vst.msk [vmem:[%s131_s1 + $0x5] ss:$16 sm:$0x3] %vm7_vm0, %v35_v15  }
  0x88   :  { %v53_v16 = vpop.permute.xlu1 %52  }
  0x89   :  { %v47_v17 = vpop.permute.xlu0 %46   ;;  %64 = vst.msk [vmem:[%s131_s1 + $0x8] ss:$16 sm:$0x3] %vm7_vm0, %v53_v16  }
  0x8a   :  { %63 = vst.msk [vmem:[%s131_s1 + $0x7] ss:$16 sm:$0x3] %vm7_vm0, %v47_v17  }

// kernel: joint_model_forward.1
= control target key start
LH: loop header
LB: loop body
LE: loop exit
PB: predicated region body
PF: predicated region fallthrough
CT: control target
= control target key end

     0   :  { %s1817_s0 = inlined_call_operand.vmem [shape: f32[6,72], index: 0, kind: input, shape index: {}]   ;;  %s1818_s1 = inlined_call_operand.vmem [shape: f32[6,72], index: 1, kind: input, shape index: {}]   ;;  %s1819_s2 = inlined_call_operand.<no memory space> [shape: f32[1], index: 2, kind: input, shape index: {}]   ;;  %s1820_s3 = inlined_call_operand.vmem [shape: f32[72,72], index: 3, kind: input, shape index: {}]   ;;  %s1821_s4 = inlined_call_operand.vmem [shape: f32[1,72], index: 4, kind: input, shape index: {}]   ;;  %s1822_s5 = inlined_call_operand.vmem [shape: f32[72,72], index: 5, kind: input, shape index: {}]   ;;  %s1823_s6 = inlined_call_operand.vmem [shape: f32[1,72], index: 6, kind: input, shape index: {}]   ;;  %s1824_s7 = inlined_call_operand.vmem [shape: f32[72,56], index: 7, kind: input, shape index: {}]   ;;  %s1825_s8 = inlined_call_operand.vmem [shape: f32[72,56], index: 8, kind: input, shape index: {}]   ;;  %s1826_s9 = inlined_call_operand.vmem [shape: f32[128,256], index: 9, kind: input, shape index: {}]   ;;  %s1827_s10 = inlined_call_operand.vmem [shape: f32[1,256], index: 10, kind: input, shape index: {}]   ;;  %s1828_s11 = inlined_call_operand.vmem [shape: f32[256,17], index: 11, kind: input, shape index: {}]   ;;  %s1829_s12 = inlined_call_operand.<no memory space> [shape: f32[1,1], index: 12, kind: input, shape index: {}]   ;;  %s1830_s13 = inlined_call_operand.vmem [shape: f32[6,288], index: 13, kind: output, shape index: {0}]   ;;  %s1831_s14 = inlined_call_operand.vmem [shape: f32[6,56], index: 14, kind: output, shape index: {1}]   ;;  %s1832_s15 = inlined_call_operand.hbm [shape: f32[2,128], index: 15, kind: output, shape index: {2}]   ;;  %s1833_s16 = inlined_call_operand.vmem [shape: f32[2,17], index: 16, kind: output, shape index: {3}]  }
   0x1   :  { %1834 = sst [smem:[#allocation7_spill]] %s1817_s0  ;;  %v23_v0 = vstv %s1829_s12 }
   0x2   :  { %24 = vst [vmem:[#allocation3] sm:$0x1] %v23_v0 }
   0x3   :  { %v54_v1 = vld [vmem:[%s1820_s3] sm:$0xff]  ;;  %v55_v2 = vld [vmem:[%s1820_s3 + $0x8] sm:$0xff]  ;;  %v56_v3 = vld [vmem:[%s1820_s3 + $0x10] sm:$0xff]  ;;  %v1273_v4 = vmov 0.0|0.0   ;;  %vm1274_vm0 = vmmov 0   ;;  %v1275_v7 = vmov 0.0  }
   0x4   :  { %1096 = vmatprep.subr.bf16.mxu0 %v1273_v4  ;;  %v1097_v5 = vpack.c.bf16 %v55_v2, %v54_v1  ;;  %v57_v6 = vld [vmem:[%s1820_s3 + $0x18] sm:$0xff]  ;;  %1030 = vmatprep.mubr.msk.f32.mxu0 %vm1274_vm0, %v1275_v7  ;;  %v58_v9 = vld [vmem:[%s1820_s3 + $0x20] sm:$0xff]  ;;  %v59_v10 = vld [vmem:[%s1820_s3 + $0x28] sm:$0xff] }
   0x5   :  { %773 = vmatprep.mubr.f32.mxu1 %v1275_v7  ;;  %v1100_v8 = vpack.c.bf16 %v57_v6, %v56_v3  ;;  %v1103_v11 = vpack.c.bf16 %v59_v10, %v58_v9 }
   0x6   :  { %1098 = vmatpush3.bf16.msra.mxu0 %v1097_v5 }
   0x7   :  { %1099 = vmatprep.subr.bf16.mxu0 %v1273_v4 }
   0xa   :  { %1101 = vmatpush3.bf16.msra.mxu0 %v1100_v8 }
   0xb   :  { %25 = vsyncpa [#allocation5], 0  ;;  %1102 = vmatprep.subr.bf16.mxu0 %v1273_v4  ;;  %v60_v12 = vld [vmem:[%s1820_s3 + $0x30] sm:$0xff]  ;;  %v61_v13 = vld [vmem:[%s1820_s3 + $0x38] sm:$0xff]  ;;  %s1835_s12 = sld [smem:[#allocation7_spill]]  ;;  %vm70_vm1 = vcmask 588800  }
   0xc   :  { %v1106_v14 = vpack.c.bf16 %v61_v13, %v60_v12  ;;  %v144_v15 = vld [vmem:[%s1822_s5] sm:$0xff]  ;;  %v145_v16 = vld [vmem:[%s1822_s5 + $0x8] sm:$0xff]  ;;  %v146_v20 = vld [vmem:[%s1822_s5 + $0x10] sm:$0xff]  ;;  %v1276_v31 = vmov 0   ;;  %v1278_v5 = vmov 683565275  }
   0xd   :  { %v62_v17 = vld [vmem:[%s1820_s3 + $0x40] sm:$0xff]  ;;  %v1109_v19 = vpack.c.bf16 %v145_v16, %v144_v15  ;;  %v147_v21 = vld [vmem:[%s1822_s5 + $0x18] sm:$0xff]  ;;  %v149_v24 = vld [vmem:[%s1822_s5 + $0x28] sm:$0xff]  ;;  %1231 = vset.pattern.permute.xlu1 %v1276_v31  ;;  %1232 = vset.pattern.permute.xlu0 %v1276_v31  ;;  %v1279_v8 = vmov 2475754826   ;;  %s1284_s21 = smov 88  }
   0xe   :  { %1104 = vmatpush3.bf16.msra.mxu0 %v1103_v11  ;;  %v1112_v22 = vpack.c.bf16 %v147_v21, %v146_v20  ;;  %v148_v23 = vld [vmem:[%s1822_s5 + $0x20] sm:$0xff]  ;;  %v150_v26 = vld [vmem:[%s1822_s5 + $0x30] sm:$0xff]  ;;  %v151_v27 = vld [vmem:[%s1822_s5 + $0x38] sm:$0xff]  ;;  %v1280_v11 = vmov 2131351028   ;;  %s1286_s18 = smov 16  }
   0xf   :  { %1105 = vmatprep.subr.bf16.mxu0 %v1273_v4  ;;  %v1115_v25 = vpack.c.bf16 %v149_v24, %v148_v23  ;;  %v1118_v28 = vpack.c.bf16 %v151_v27, %v150_v26  ;;  %v152_v29 = vld [vmem:[%s1822_s5 + $0x40] sm:$0xff]  ;;  %v489_v34 = vld [vmem:[%s1825_s8 + $0x8] sm:$0xff]  ;;  %v490_v35 = vld [vmem:[%s1825_s8 + $0x10] sm:$0xff] }
  0x10   :  { %v53_v30 = vld [vmem:[%s1818_s1] sm:$0x3f]  ;;  %v491_v37 = vld [vmem:[%s1825_s8 + $0x18] sm:$0xff]  ;;  %v493_v40 = vld [vmem:[%s1825_s8 + $0x28] sm:$0xff] }
  0x11   :  { %v1420_v18 = vld [vmem:[%s1835_s12] sm:$0x3f]  ;;  %v1124_v38 = vpack.c.bf16 %v491_v37, %v490_v35  ;;  %v494_v42 = vld [vmem:[%s1825_s8 + $0x30] sm:$0xff]  ;;  %v495_v43 = vld [vmem:[%s1825_s8 + $0x38] sm:$0xff] }
  0x12   :  { %1107 = vmatpush3.bf16.msra.mxu0 %v1106_v14  ;;  %v936_v32 = vld [vmem:[#allocation3] ss:$0 sm:$0xff]  ;;  %v1130_v44 = vpack.c.bf16 %v495_v43, %v494_v42  ;;  %v1281_v14 = vmov 2102212464  }
  0x13   :  { %1028 = vmatprep.subr.mxu0 %v1275_v7  ;;  %821 = vperm.xlu1 %1231, %v936_v32   ;;  %v488_v33 = vld [vmem:[%s1825_s8] sm:$0xff] }
  0x14   :  { %v1121_v36 = vpack.c.bf16 %v489_v34, %v488_v33  ;;  %v492_v39 = vld [vmem:[%s1825_s8 + $0x20] sm:$0xff] }
  0x15   :  { %v1127_v41 = vpack.c.bf16 %v493_v40, %v492_v39  ;;  %v496_v45 = vld [vmem:[%s1825_s8 + $0x40] sm:$0xff]  ;;  %s1277_s8 = smov 72  }
  0x16   :  { %1029 = vmatpush3.msra.mxu0 %v62_v17  ;;  %v924_v48 = vld [vmem:[%s1823_s6] ss:$0 sm:$0xff] }
  0x17   :  { %1031 = vmatmul.mubr.msk.f32.vlgmr.msra.gmra.mrb[0].mxu0 %vm70_vm1, %v1420_v18  ;;  %1108 = vmatprep.subr.bf16.mxu0 %v1273_v4  ;;  %v922_v52 = vld [vmem:[%s1821_s4] ss:$0 sm:$0xff] }
  0x18   :  { %1110 = vmatpush3.bf16.msra.mxu0 %v1109_v19  ;;  %1051 = vmatprep.mubr.msk.f32.mxu0 %vm1274_vm0, %v1275_v7  ;;  %v1282_v19 = vmov 920167782  }
  0x19   :  { %1111 = vmatprep.subr.bf16.mxu0 %v1273_v4 }
  0x1c   :  { %1113 = vmatpush3.bf16.msra.mxu0 %v1112_v22  ;;  %v1283_v22 = vmov 1326507024  }
  0x1d   :  { %1114 = vmatprep.subr.bf16.mxu0 %v1273_v4 }
  0x20   :  { %1116 = vmatpush3.bf16.msra.mxu0 %v1115_v25 }
  0x21   :  { %1117 = vmatprep.subr.bf16.mxu0 %v1273_v4 }
  0x24   :  { %1119 = vmatpush3.bf16.msra.mxu0 %v1118_v28 }
  0x25   :  { %1049 = vmatprep.subr.mxu0 %v1275_v7 }
  0x28   :  { %1050 = vmatpush3.msra.mxu0 %v152_v29 }
  0x29   :  { %1052 = vmatmul.mubr.msk.f32.vlgmr.msra.gmra.mrb[2].mxu0 %vm70_vm1, %v53_v30  ;;  %1120 = vmatprep.subr.bf16.mxu0 %v1273_v4 }
  0x2a   :  { %1072 = vmatprep.mubr.msk.f32.mxu0 %vm1274_vm0, %v1275_v7  ;;  %1122 = vmatpush3.bf16.msra.mxu0 %v1121_v36 }
  0x2b   :  { %1123 = vmatprep.subr.bf16.mxu0 %v1273_v4 }
  0x2e   :  { %1125 = vmatpush3.bf16.msra.mxu0 %v1124_v38 }
  0x2f   :  { %1126 = vmatprep.subr.bf16.mxu0 %v1273_v4 }
  0x32   :  { %1128 = vmatpush3.bf16.msra.mxu0 %v1127_v41 }
  0x33   :  { %1129 = vmatprep.subr.bf16.mxu0 %v1273_v4 }
  0x36   :  { %1131 = vmatpush3.bf16.msra.mxu0 %v1130_v44 }
  0x37   :  { %1070 = vmatprep.subr.mxu0 %v1275_v7 }
  0x3a   :  { %1071 = vmatpush3.msra.mxu0 %v496_v45 }
  0x3b   :  { %1132 = vmatprep.subr.bf16.mxu0 %v1273_v4 }
  0xea   :  { %v140_v46 = vpop.f32.mrb[0].mxu0 }
  0xeb   :  { %v1032_v47 = vpop.f32.mrb[1].mxu0  ;;  %v141_v53 = vadd.f32 %v922_v52, %v140_v46 }
  0xed   :  { %v233_v55 = vsub.f32 0.0, %v141_v53 }
  0xef   :  { %v234_v58 = vmul.f32 1.442695, %v233_v55 }
  0xfc   :  { %v229_v49 = vpop.f32.mrb[2].mxu0 }
  0xfd   :  { %v230_v50 = vadd.f32 %v924_v48, %v229_v49  ;;  %v1053_v51 = vpop.f32.mrb[3].mxu0 }
  0xff   :  { %1233 = vtanh.f32 %v230_v50 }
 0x100   :  { %1235 = vpow2.f32 %v234_v58 }
 0x109   :  { %v1234_v54 = vpop.eup %1233 }
 0x10a   :  { %v1497_v56 = vadd.f32 %v1234_v54, %v53_v30  ;;  %v1236_v16 = vpop.eup %1235 }
 0x10b   :  { %v236_v30 = vadd.f32 1.0, %v1236_v16 }
 0x10c   :  { %v244_v57 = vand.u32 2139095040, %v1497_v56  ;;  %451 = vrot.lane.b32.xlu1 %v1497_v56, %s1277_s8  ;;  %v241_v62 = vand.u32 2147483647, %v1497_v56  ;;  %vm243_vm8 = vcmp.lt.s32.totalorder %v1497_v56, 0 }
 0x10d   :  { %1237 = vrcp.f32 %v236_v30 }
 0x10e   :  { %v245_v59 = vshrl.u32 %v244_v57, 23  ;;  %v248_v2 = vand.u32 8388607, %v241_v62  ;;  %vm1517_vm9 = vcmp.le.f32.partialorder %v241_v62, 0.7853982 }
 0x110   :  { %v926_v60 = vadd.s32 4294967169, %v245_v59  ;;  %v249_v24 = vor.u32 8388608, %v248_v2  ;;  %v1575_v59 = vpop.permute.xlu1 %821 }
 0x112   :  { %v251_v61 = vadd.s32 1, %v926_v60  ;;  %v289_v39 = vshll.u32 %v249_v24, 8 }
 0x114   :  { %vm252_vm2 = vcmp.gt.s32.totalorder %v251_v61, 0 }
 0x115   :  { %v253_v63 = vsel %vm252_vm2, %v251_v61, 0 }
 0x116   :  { %v255_v0 = vand.u32 31, %v253_v63  ;;  %v254_v3 = vshrl.u32 %v253_v63, 5 }
 0x117   :  { %v1238_v55 = vpop.eup %1237 }
 0x118   :  { %v256_v1 = vsub.s32 32, %v255_v0  ;;  %v258_v6 = vshll.u32 %v1278_v5, %v255_v0  ;;  %v261_v9 = vshll.u32 %v1279_v8, %v255_v0  ;;  %v264_v13 = vshll.u32 %v1280_v11, %v255_v0 }
 0x119   :  { %v267_v17 = vshll.u32 %v1281_v14, %v255_v0  ;;  %v270_v21 = vshll.u32 %v1282_v19, %v255_v0  ;;  %vm273_vm3 = vcmp.lt.s32.totalorder %v254_v3, 1  ;;  %vm276_vm4 = vcmp.lt.s32.totalorder %v254_v3, 4 }
 0x11a   :  { %v259_v10 = vshrl.u32 %v1279_v8, %v256_v1  ;;  %v262_v12 = vshrl.u32 %v1280_v11, %v256_v1  ;;  %v265_v15 = vshrl.u32 %v1281_v14, %v256_v1  ;;  %v268_v20 = vshrl.u32 %v1282_v19, %v256_v1 }
 0x11b   :  { %v271_v23 = vshrl.u32 %v1283_v22, %v256_v1  ;;  %v257_v34 = vshrl.u32 %v1278_v5, %v256_v1  ;;  %vm275_vm5 = vcmp.lt.s32.totalorder %v254_v3, 3  ;;  %vm274_vm6 = vcmp.lt.s32.totalorder %v254_v3, 2 }
 0x11c   :  { %v260_v25 = vor.u32 %v259_v10, %v258_v6  ;;  %v263_v26 = vor.u32 %v262_v12, %v261_v9  ;;  %v266_v27 = vor.u32 %v265_v15, %v264_v13  ;;  %v269_v28 = vor.u32 %v268_v20, %v267_v17 }
 0x11d   :  { %v272_v29 = vor.u32 %v271_v23, %v270_v21  ;;  %v1524_v63 = vmul.f32 %v1238_v55, %v1420_v18 }
 0x11e   :  { %v278_v31 = vsel %vm276_vm4, %v266_v27, 2102212464  ;;  %v281_v32 = vsel %vm273_vm3, %v260_v25, %v263_v26  ;;  %v285_v33 = vsel %vm273_vm3, %v263_v26, %v266_v27  ;;  %v282_v35 = vsel %vm276_vm4, %v269_v28, 920167782 }
 0x11f   :  { %v286_v36 = vsel %vm276_vm4, %v272_v29, 1326507024  ;;  %v283_v37 = vsel %vm275_vm5, %v266_v27, %v282_v35  ;;  %v277_v40 = vsel %vm273_vm3, %v257_v34, %v260_v25  ;;  %v279_v41 = vsel %vm275_vm5, %v263_v26, %v278_v31  ;;  %v478_v35 = vld [vmem:[%s1824_s7] sm:$0xff] }
 0x120   :  { %v287_v38 = vsel %vm275_vm5, %v269_v28, %v286_v36  ;;  %v284_v42 = vsel %vm274_vm6, %v281_v32, %v283_v37  ;;  %v280_v48 = vsel %vm274_vm6, %v277_v40, %v279_v41  ;;  %v471_v3 = vmax.f32 %v1524_v63, 1e-12  ;;  %v479_v36 = vld [vmem:[%s1824_s7 + $0x8] sm:$0xff] }
 0x121   :  { %v288_v43 = vsel %vm274_vm6, %v285_v33, %v287_v38  ;;  %v1508_v46 = vmul.u32.u64.low %v289_v39, %v284_v42  ;;  %v1509_v47 = vmul.u32.u64.high %v289_v39, %v284_v42, %v1508_v46  ;;  %v296_v50 = vmul.u32 %v289_v39, %v280_v48  ;;  %v480_v48 = vld [vmem:[%s1824_s7 + $0x10] sm:$0xff] }
 0x122   :  { %v1505_v44 = vmul.u32.u64.low %v289_v39, %v288_v43  ;;  %v1506_v45 = vmul.u32.u64.high %v289_v39, %v288_v43, %v1505_v44  ;;  %1239 = vlog2.f32 %v471_v3  ;;  %vm333_vm3 = vweird.f32 %v1497_v56  ;;  %v667_v3 = vld [vmem:[%s1826_s9 + $0x10] sm:$0xff] }
 0x123   :  { %v299_v49 = vadd.s32 1, %v1509_v47  ;;  %v1133_v44 = vpack.c.bf16 %v479_v36, %v478_v35  ;;  %v685_v35 = vld [vmem:[%s1826_s9 + $0xa0] sm:$0xff]  ;;  %v687_v36 = vld [vmem:[%s1826_s9 + $0xb0] sm:$0xff]  ;;  %vm654_vm4 = vcmask 457728   ;;  %vm656_vm5 = vcmask 916480  }
 0x124   :  { %vm298_vm7 = vc.u32 %v1506_v45, %v1508_v46  ;;  %v297_v8 = vadd.s32 %v1508_v46, %v1506_v45  ;;  %vm463_vm6 = vcmask 130048  }
 0x125   :  { %v300_v51 = vsel %vm298_vm7, %v299_v49, %v1509_v47  ;;  %v481_v49 = vld [vmem:[%s1824_s7 + $0x18] sm:$0xff]  ;;  %vm465_vm7 = vcmask 719872  }
 0x126   :  { %v301_v52 = vadd.s32 %v300_v51, %v296_v50  ;;  %v482_v50 = vld [vmem:[%s1824_s7 + $0x20] sm:$0xff]  ;;  %v483_v51 = vld [vmem:[%s1824_s7 + $0x28] sm:$0xff] }
 0x128   :  { %v302_v53 = vadd.s32 536870912, %v301_v52 }
 0x12a   :  { %v303_v54 = vshrl.u32 %v302_v53, 30  ;;  %v484_v53 = vld [vmem:[%s1824_s7 + $0x30] sm:$0xff] }
 0x12c   :  { %v304_v57 = vshll.u32 %v303_v54, 30  ;;  %v327_v58 = vsub.s32 4, %v303_v54  ;;  %v1240_v16 = vpop.eup %1239 }
 0x12d   :  { %v473_v21 = vmul.f32 0.6931472, %v1240_v16  ;;  %v675_v16 = vld [vmem:[%s1826_s9 + $0x50] sm:$0xff] }
 0x12e   :  { %v305_v60 = vsub.s32 %v301_v52, %v304_v57  ;;  %v328_v61 = vsel %vm243_vm8, %v327_v58, %v303_v54  ;;  %v1139_v52 = vpack.c.bf16 %v483_v51, %v482_v50  ;;  %v485_v54 = vld [vmem:[%s1824_s7 + $0x38] sm:$0xff]  ;;  %v486_v57 = vld [vmem:[%s1824_s7 + $0x40] sm:$0xff] }
 0x12f   :  { %v330_v0 = vsel %vm1517_vm9, 0, %v328_v61  ;;  %v474_v24 = vmul.f32 3.3333333, %v473_v21  ;;  %v1142_v55 = vpack.c.bf16 %v485_v54, %v484_v53  ;;  %v666_v61 = vld [vmem:[%s1826_s9 + $0x8] sm:$0xff]  ;;  %v798_v51 = vld [vmem:[%s1828_s11 + $0x80] sm:$0xff] }
 0x130   :  { %v307_v1 = vsub.s32 0, %v305_v60  ;;  %v437_v27 = vadd.s32 3, %v330_v0  ;;  %v334_v29 = vand.u32 3, %v330_v0  ;;  %v668_v0 = vld [vmem:[%s1826_s9 + $0x18] sm:$0xff] }
 0x131   :  { %v475_v26 = vmul.f32 1.442695, %v474_v24  ;;  %v682_v24 = vld [vmem:[%s1826_s9 + $0x88] sm:$0xff] }
 0x132   :  { %v927_v2 = vmin.u32 %v307_v1, %v305_v60  ;;  %v438_v28 = vand.u32 3, %v437_v27  ;;  %vm339_vm12 = vcmp.eq.s32.totalorder %v334_v29, 2  ;;  %vm336_vm14 = vcmp.eq.s32.totalorder %v334_v29, 0  ;;  %v665_v1 = vld [vmem:[%s1826_s9] sm:$0xff] }
 0x133   :  { %vm335_vm2 = vcmp.lt.s32.totalorder %v334_v29, 2  ;;  %v681_v29 = vld [vmem:[%s1826_s9 + $0x80] sm:$0xff] }
 0x134   :  { %v309_v5 = vclz %v927_v2  ;;  %vm443_vm11 = vcmp.eq.s32.totalorder %v438_v28, 2  ;;  %vm440_vm13 = vcmp.eq.s32.totalorder %v438_v28, 0  ;;  %vm439_vm15 = vcmp.lt.s32.totalorder %v438_v28, 2 }
 0x135   :  { %v1144_v2 = vpack.c.bf16 %v668_v0, %v666_v61  ;;  %v783_v61 = vld [vmem:[%s1828_s11 + $0x8] sm:$0xff] }
 0x136   :  { %v928_v6 = vadd.s32 4294967294, %v309_v5  ;;  %v670_v5 = vld [vmem:[%s1826_s9 + $0x28] sm:$0xff] }
 0x137   :  { %1145 = vmatprep.subr.bf16.mxu1 %v1144_v2 }
 0x138   :  { %vm929_vm10 = vcmp.lt.s32.totalorder %v928_v6, 0 }
 0x139   :  { %v312_v62 = vsel %vm929_vm10, 0, %v928_v6  ;;  %v672_v6 = vld [vmem:[%s1826_s9 + $0x38] sm:$0xff] }
 0x13a   :  { %v313_v9 = vsub.s32 32, %v312_v62  ;;  %v317_v10 = vsub.s32 4294967266, %v312_v62  ;;  %v314_v11 = vshll.u32 %v305_v60, %v312_v62 }
 0x13c   :  { %v315_v12 = vshrl.u32 %v297_v8, %v313_v9  ;;  %v318_v18 = vadd.s32 127, %v317_v10  ;;  %v1146_v8 = vpack.c.bf16 %v667_v3, %v665_v1  ;;  %v1148_v9 = vpack.c.bf16 %v672_v6, %v670_v5  ;;  %v669_v10 = vld [vmem:[%s1826_s9 + $0x20] sm:$0xff]  ;;  %v800_v1 = vld [vmem:[%s1828_s11 + $0x90] sm:$0xff] }
 0x13e   :  { %v316_v13 = vor.u32 %v315_v12, %v314_v11  ;;  %v319_v14 = vshll.u32 %v318_v18, 23  ;;  %v671_v11 = vld [vmem:[%s1826_s9 + $0x30] sm:$0xff]  ;;  %v674_v12 = vld [vmem:[%s1826_s9 + $0x48] sm:$0xff]  ;;  %v676_v18 = vld [vmem:[%s1826_s9 + $0x58] sm:$0xff]  ;;  %1147 = vmatpush1.bf16.msra.mxu1 %v1146_v8 }
 0x13f   :  { %1149 = vmatprep.subr.bf16.mxu1 %v1148_v9  ;;  %v784_v9 = vld [vmem:[%s1828_s11 + $0x10] sm:$0xff] }
 0x140   :  { %v320_v15 = vor.u32 4788187, %v319_v14  ;;  %v323_v19 = vcvt.s32.f32 %v316_v13  ;;  %v1150_v13 = vpack.c.bf16 %v671_v11, %v669_v10  ;;  %v1152_v14 = vpack.c.bf16 %v676_v18, %v674_v12  ;;  %v785_v10 = vld [vmem:[%s1828_s11 + $0x18] sm:$0xff]  ;;  %v802_v11 = vld [vmem:[%s1828_s11 + $0xa0] sm:$0xff]  ;;  %v803_v12 = vld [vmem:[%s1828_s11 + $0xa8] sm:$0xff] }
 0x142   :  { %v321_v17 = vand.u32 2147483647, %v320_v15  ;;  %v673_v15 = vld [vmem:[%s1826_s9 + $0x40] sm:$0xff]  ;;  %1151 = vmatpush1.bf16.msra.mxu1 %v1150_v13 }
 0x143   :  { %1153 = vmatprep.subr.bf16.mxu1 %v1152_v14  ;;  %v1182_v14 = vpack.c.bf16 %v785_v10, %v784_v9 }
 0x144   :  { %v324_v20 = vmul.f32 %v323_v19, %v321_v17  ;;  %v678_v17 = vld [vmem:[%s1826_s9 + $0x68] sm:$0xff]  ;;  %v680_v19 = vld [vmem:[%s1826_s9 + $0x78] sm:$0xff] }
 0x145   :  { %v1156_v21 = vpack.c.bf16 %v680_v19, %v678_v17  ;;  %v786_v17 = vld [vmem:[%s1828_s11 + $0x20] sm:$0xff]  ;;  %v787_v19 = vld [vmem:[%s1828_s11 + $0x28] sm:$0xff] }
 0x146   :  { %v325_v22 = vxor.u32 2147483648, %v324_v20 }
 0x148   :  { %v326_v23 = vsel %vm243_vm8, %v325_v22, %v324_v20  ;;  %v1154_v20 = vpack.c.bf16 %v675_v16, %v673_v15  ;;  %v677_v22 = vld [vmem:[%s1826_s9 + $0x60] sm:$0xff]  ;;  %v1184_v16 = vpack.c.bf16 %v803_v12, %v802_v11 }
 0x149   :  { %v329_v25 = vsel %vm1517_vm9, %v1497_v56, %v326_v23  ;;  %v1136_v56 = vpack.c.bf16 %v481_v49, %v480_v48  ;;  %v679_v23 = vld [vmem:[%s1826_s9 + $0x70] sm:$0xff]  ;;  %v693_v48 = vld [vmem:[%s1826_s9 + $0xe0] sm:$0xff] }
 0x14a   :  { %1241 = vcosq.f32 %v329_v25  ;;  %1155 = vmatpush1.bf16.msra.mxu1 %v1154_v20  ;;  %v1158_v27 = vpack.c.bf16 %v679_v23, %v677_v22  ;;  %v695_v49 = vld [vmem:[%s1826_s9 + $0xf0] sm:$0xff]  ;;  %v1186_v20 = vpack.c.bf16 %v787_v19, %v786_v17  ;;  %v789_v23 = vld [vmem:[%s1828_s11 + $0x38] sm:$0xff] }
 0x14b   :  { %1243 = vsinq.f32 %v329_v25  ;;  %v684_v25 = vld [vmem:[%s1826_s9 + $0x98] sm:$0xff]  ;;  %1157 = vmatprep.subr.bf16.mxu1 %v1156_v21  ;;  %v788_v22 = vld [vmem:[%s1828_s11 + $0x30] sm:$0xff] }
 0x14c   :  { %1245 = vpow2.f32 %v475_v26  ;;  %v1160_v28 = vpack.c.bf16 %v684_v25, %v682_v24  ;;  %v806_v24 = vld [vmem:[%s1828_s11 + $0xc0] sm:$0xff]  ;;  %v807_v25 = vld [vmem:[%s1828_s11 + $0xc8] sm:$0xff] }
 0x14e   :  { %1159 = vmatpush1.bf16.msra.mxu1 %v1158_v27  ;;  %v1192_v27 = vpack.c.bf16 %v807_v25, %v806_v24 }
 0x14f   :  { %1161 = vmatprep.subr.bf16.mxu1 %v1160_v28  ;;  %v790_v28 = vld [vmem:[%s1828_s11 + $0x40] sm:$0xff] }
 0x154   :  { %v1242_v30 = vpop.eup %1241 }
 0x155   :  { %v1244_v31 = vpop.eup %1243  ;;  %v340_v32 = vxor.u32 2147483648, %v1242_v30 }
 0x156   :  { %v337_v33 = vxor.u32 2147483648, %v1244_v31  ;;  %v1246_v42 = vpop.eup %1245 }
 0x157   :  { %v445_v34 = vsel %vm443_vm11, %v340_v32, %v1244_v31  ;;  %v341_v37 = vsel %vm339_vm12, %v340_v32, %v1244_v31  ;;  %v686_v31 = vld [vmem:[%s1826_s9 + $0xa8] sm:$0xff]  ;;  %v688_v32 = vld [vmem:[%s1826_s9 + $0xb8] sm:$0xff] }
 0x158   :  { %v442_v38 = vsel %vm440_vm13, %v1242_v30, %v337_v33  ;;  %v338_v39 = vsel %vm336_vm14, %v1242_v30, %v337_v33  ;;  %v683_v30 = vld [vmem:[%s1826_s9 + $0x90] sm:$0xff] }
 0x159   :  { %v446_v40 = vsel %vm439_vm15, %v442_v38, %v445_v34  ;;  %v342_v41 = vsel %vm335_vm2, %v338_v39, %v341_v37  ;;  %v1162_v33 = vpack.c.bf16 %v683_v30, %v681_v29  ;;  %v1164_v34 = vpack.c.bf16 %v688_v32, %v686_v31  ;;  %v690_v37 = vld [vmem:[%s1826_s9 + $0xc8] sm:$0xff]  ;;  %v692_v38 = vld [vmem:[%s1826_s9 + $0xd8] sm:$0xff]  ;;  %v808_v30 = vld [vmem:[%s1828_s11 + $0xd0] sm:$0xff] }
 0x15a   :  { %v447_v43 = vsel %vm333_vm3, nan, %v446_v40  ;;  %v1542_v45 = vsel %vm333_vm3, nan, %v342_v41  ;;  %v1166_v39 = vpack.c.bf16 %v687_v36, %v685_v35  ;;  %v1168_v40 = vpack.c.bf16 %v692_v38, %v690_v37  ;;  %v689_v41 = vld [vmem:[%s1826_s9 + $0xc0] sm:$0xff]  ;;  %v791_v29 = vld [vmem:[%s1828_s11 + $0x48] sm:$0xff]  ;;  %v809_v31 = vld [vmem:[%s1828_s11 + $0xd8] sm:$0xff] }
 0x15b   :  { %v487_v46 = vmul.f32 %v1246_v42, %v447_v43  ;;  %v449_v47 = vmul.f32 %v447_v43, %v1524_v63  ;;  %v477_v58 = vmul.f32 %v1246_v42, %v1542_v45  ;;  %1163 = vmatpush1.bf16.msra.mxu1 %v1162_v33  ;;  %v691_v42 = vld [vmem:[%s1826_s9 + $0xd0] sm:$0xff]  ;;  %v1194_v32 = vpack.c.bf16 %v791_v29, %v790_v28  ;;  %v793_v35 = vld [vmem:[%s1828_s11 + $0x58] sm:$0xff]  ;;  %v810_v36 = vld [vmem:[%s1828_s11 + $0xe0] sm:$0xff] }
 0x15c   :  { %1165 = vmatprep.subr.bf16.mxu1 %v1164_v34  ;;  %v1170_v43 = vpack.c.bf16 %v691_v42, %v689_v41  ;;  %v1196_v33 = vpack.c.bf16 %v809_v31, %v808_v30  ;;  %v792_v34 = vld [vmem:[%s1828_s11 + $0x50] sm:$0xff]  ;;  %v811_v37 = vld [vmem:[%s1828_s11 + $0xe8] sm:$0xff] }
 0x15d   :  { %1073 = vmatmul.mubr.msk.f32.vlgmr.msra.gmra.mrb[4].mxu0 %vm70_vm1, %v487_v46  ;;  %459 = vrot.lane.b32.xlu1 %v449_v47, %s1284_s21  ;;  %v696_v46 = vld [vmem:[%s1826_s9 + $0xf8] sm:$0xff]  ;;  %v1198_v38 = vpack.c.bf16 %v793_v35, %v792_v34  ;;  %v795_v41 = vld [vmem:[%s1828_s11 + $0x68] sm:$0xff] }
 0x15e   :  { %1134 = vmatpush3.bf16.msra.mxu0 %v1133_v44  ;;  %1093 = vmatprep.mubr.msk.f32.mxu0 %vm1274_vm0, %v1275_v7  ;;  %vm469_vm0 = vcmask 259072   ;;  %v694_v44 = vld [vmem:[%s1826_s9 + $0xe8] sm:$0xff]  ;;  %s1285_s9 = smov 56  }
 0x15f   :  { %1135 = vmatprep.subr.bf16.mxu0 %v1273_v4  ;;  %1167 = vmatpush1.bf16.msra.mxu1 %v1166_v39  ;;  %v1172_v47 = vpack.c.bf16 %v696_v46, %v694_v44  ;;  %v1200_v39 = vpack.c.bf16 %v811_v37, %v810_v36  ;;  %v813_v44 = vld [vmem:[%s1828_s11 + $0xf8] sm:$0xff] }
 0x160   :  { %1169 = vmatprep.subr.bf16.mxu1 %v1168_v40  ;;  %v794_v40 = vld [vmem:[%s1828_s11 + $0x60] sm:$0xff] }
 0x161   :  { %v1202_v42 = vpack.c.bf16 %v795_v41, %v794_v40 }
 0x162   :  { %1137 = vmatpush3.bf16.msra.mxu0 %v1136_v56  ;;  %v1174_v56 = vpack.c.bf16 %v695_v49, %v693_v48  ;;  %v797_v48 = vld [vmem:[%s1828_s11 + $0x78] sm:$0xff] }
 0x163   :  { %1138 = vmatprep.subr.bf16.mxu0 %v1273_v4  ;;  %1171 = vmatpush1.bf16.msra.mxu1 %v1170_v43  ;;  %v812_v43 = vld [vmem:[%s1828_s11 + $0xf0] sm:$0xff] }
 0x164   :  { %1173 = vmatprep.subr.bf16.mxu1 %v1172_v47  ;;  %v1204_v46 = vpack.c.bf16 %v813_v44, %v812_v43  ;;  %v796_v47 = vld [vmem:[%s1828_s11 + $0x70] sm:$0xff] }
 0x165   :  { %v1206_v49 = vpack.c.bf16 %v797_v48, %v796_v47 }
 0x166   :  { %1140 = vmatpush3.bf16.msra.mxu0 %v1139_v52  ;;  %v799_v52 = vld [vmem:[%s1828_s11 + $0x88] sm:$0xff] }
 0x167   :  { %1141 = vmatprep.subr.bf16.mxu0 %v1273_v4  ;;  %1175 = vmatpush1.bf16.msra.mxu1 %v1174_v56  ;;  %v699_v56 = vlaneseq }
 0x16a   :  { %1143 = vmatpush3.bf16.msra.mxu0 %v1142_v55  ;;  %v1176_v55 = vpack.c.bf16 %v799_v52, %v798_v51  ;;  %v697_v52 = vld [vmem:[%s1827_s10] sm:$0x3] }
 0x16b   :  { %1091 = vmatprep.subr.mxu0 %v1275_v7  ;;  %v659_v7 = vstv %s1819_s2 }
 0x16c   :  { %1247 = vrcp.f32 %v659_v7  ;;  %1177 = vmatprep.subr.bf16.mxu1 %v1176_v55  ;;  %v782_v7 = vld [vmem:[%s1828_s11] sm:$0xff] }
 0x16d   :  { %v1178_v5 = vpack.c.bf16 %v783_v61, %v782_v7 }
 0x16e   :  { %1092 = vmatpush3.msra.mxu0 %v486_v57 }
 0x16f   :  { %1094 = vmatmul.mubr.msk.f32.vlgmr.msra.gmra.mrb[4].mxu0 %vm70_vm1, %v477_v58  ;;  %v448_v58 = vmul.f32 %v1542_v45, %v1524_v63 }
 0x176   :  { %v1248_v26 = vpop.eup %1247 }
 0x177   :  { %1214 = vpush %v1248_v26  ;;  %v1190_v26 = vpack.c.bf16 %v789_v23, %v788_v22 }
 0x17e   :  { %v1577_v60 = vpop.permute.xlu1 %451 }
 0x17f   :  { %v462_v4 = vsel %vm70_vm1, %v1524_v63, %v1577_v60  ;;  %vm643_vm1 = vcmask 455680   ;;  %v801_v63 = vld [vmem:[%s1828_s11 + $0x98] sm:$0xff] }
 0x180   :  { %467 = vst [vmem:[%s1830_s13] sm:$0x3f] %v462_v4  ;;  %v1180_v8 = vpack.c.bf16 %v801_v63, %v800_v1 }
 0x1a8   :  { %s1215_s19 = spop %1214 }
 0x1a9   :  { %v662_v0 = vstv %s1215_s19 }
 0x1cf   :  { %v1606_v62 = vpop.permute.xlu1 %459 }
 0x1d0   :  { %470 = vst.msk [vmem:[%s1830_s13 + $0x10] sm:$0x3f] %vm469_vm0, %v1606_v62 }
 0x242   :  { %v639_v50 = vpop.f32.mrb[4].mxu0 }
 0x243   :  { %644 = vst.msk [vmem:[%s1831_s14] sm:$0x3f] %vm643_vm1, %v639_v50  ;;  %v1095_v53 = vpop.f32.mrb[5].mxu0  ;;  %v646_v54 = vrot.slane %v639_v50, 2  ;;  %v650_v57 = vrot.slane %v639_v50, 4 }
 0x245   :  { %647 = vrot.lane.b32.xlu0 %v646_v54, %s1285_s9 }
 0x249   :  { %651 = vrot.lane.b32.xlu0 %v650_v57, %s1277_s8 }
 0x24d   :  { %455 = vrot.lane.b32.xlu0 %v448_v58, %s1286_s18 }
 0x2b7   :  { %v648_v4 = vpop.permute.xlu0 %647 }
 0x2b8   :  { %v655_v45 = vsel %vm654_vm4, %v639_v50, %v648_v4  ;;  %v700_v50 = vshrl.u32 %v699_v56, 7 }
 0x2ba   :  { %v701_v51 = vsub.s32 0, %v700_v50  ;;  %v705_v53 = vsub.s32 1, %v700_v50 }
 0x2bb   :  { %v652_v2 = vpop.permute.xlu0 %651 }
 0x2bc   :  { %v657_v3 = vsel %vm656_vm5, %v655_v45, %v652_v2  ;;  %v702_v54 = vrot.slane %v697_v52, %v701_v51  ;;  %v706_v55 = vrot.slane %v697_v52, %v705_v53 }
 0x2bd   :  { %v663_v6 = vmul.f32 %v662_v0, %v657_v3 }
 0x2bf   :  { %664 = vst [vmem:[#allocation4] sm:$0x3] %v663_v6  ;;  %774 = vmatmul.mubr.f32.vlgmr.msra.gmra.mrb[0].mxu1 %v663_v6  ;;  %v456_v18 = vpop.permute.xlu0 %455 }
 0x2c0   :  { %v464_v13 = vsel %vm463_vm6, %v1577_v60, %v456_v18  ;;  %1179 = vmatpush3.bf16.msra.mxu1 %v1178_v5  ;;  %v804_v60 = vld [vmem:[%s1828_s11 + $0xb0] sm:$0xff] }
 0x2c1   :  { %v466_v15 = vsel %vm465_vm7, %v464_v13, %v1606_v62  ;;  %1181 = vmatprep.subr.bf16.mxu1 %v1180_v8  ;;  %v805_v62 = vld [vmem:[%s1828_s11 + $0xb8] sm:$0xff]  ;;  %s1287_s11 = smov [#allocation4]  }
 0x2c2   :  { %468 = vst [vmem:[%s1830_s13 + $0x8] sm:$0x3f] %v466_v15  ;;  %v1188_v21 = vpack.c.bf16 %v805_v62, %v804_v60  ;;  %s906_s26 = sshll.u32 %s1287_s11, 4  ;;  %s907_s26 = int_to_ptr.vmem [resolvable:$true] %s906_s26 }
 0x2c3   :  { %s1249_s27 = scalar_lea.vmem %s907_s26, 32  ;;  %p1254_p1 = scmp.lt.s32.totalorder %s907_s26, %s907_s26 }
 0x2c4   :  { %1183 = vmatpush3.bf16.msra.mxu1 %v1182_v14  ;;  %p1250_p0 = scmp.ne.s32.totalorder %s907_s26, %s1249_s27  ;;  %p1255_p2 = scmp.lt.s32.totalorder %s1249_s27, %s1249_s27 }
 0x2c5   :  { %1185 = vmatprep.subr.bf16.mxu1 %v1184_v16 }
 0x2c6   :  { %p1256_p3 = por %p1255_p2, %p1254_p1 }
 0x2c8   :  { %1187 = vmatpush3.bf16.msra.mxu1 %v1186_v20  ;;  %p1257_p4 = pnand %p1256_p3, %p1250_p0 }
 0x2c9   :  { %1189 = vmatprep.subr.bf16.mxu1 %v1188_v21 }
 0x2cc   :  { %1191 = vmatpush3.bf16.msra.mxu1 %v1190_v26 }
 0x2cd   :  { %1193 = vmatprep.subr.bf16.mxu1 %v1192_v27 }
 0x2d0   :  { %1195 = vmatpush3.bf16.msra.mxu1 %v1194_v32 }
 0x2d1   :  { %1197 = vmatprep.subr.bf16.mxu1 %v1196_v33 }
 0x2d4   :  { %1199 = vmatpush3.bf16.msra.mxu1 %v1198_v38 }
 0x2d5   :  { %1201 = vmatprep.subr.bf16.mxu1 %v1200_v39 }
 0x2d8   :  { %1203 = vmatpush3.bf16.msra.mxu1 %v1202_v42 }
 0x2d9   :  { %1205 = vmatprep.subr.bf16.mxu1 %v1204_v46 }
 0x2dc   :  { %1207 = vmatpush3.bf16.msra.mxu1 %v1206_v49 }
 0x392   :  { %v775_v57 = vpop.f32.mrb[0].mxu1 }
 0x393   :  { %v776_v58 = vadd.f32 %v775_v57, %v702_v54  ;;  %v777_v4 = vpop.f32.mrb[1].mxu1 }
 0x394   :  { %v778_v7 = vadd.f32 %v777_v4, %v706_v55 }
 0x395   :  { %v780_v0 = vmax.f32 %v776_v58, 0.0 }
 0x396   :  { %v781_v61 = vmax.f32 %v778_v7, 0.0 }
 0x398   :  { %888 = vmatprep.mubr.f32.mxu1 %v781_v61 }
 0x399   :  { %889 = vmatmul.mubr.f32.vlgmr.msra.gmra.mrb[2].mxu1 %v780_v0 }
 0x39a   :  { %1260 = shalt.err (!%p1257_p4)
}
 0x39b   :  { %s1261_s29 = scalar_lea.hbm %s1832_s15, 32 }
 0x39c   :  { %p1262_p5 = scmp.ne.s32.totalorder %s1832_s15, %s1261_s29  ;;  %p1265_p6 = scmp.lt.u32.totalorder %s1261_s29, %s1832_s15 }
 0x39e   :  { %p1267_p7 = pnand %p1265_p6, %p1262_p5 }
 0x3a0   :  { %1270 = shalt.err (!%p1267_p7)
}
 0x3a1   :  { %909 = dma.vmem_to_hbm [thread:$0]  %s907_s26, 32, %s1832_s15, [#allocation5]   ;;  %vm894_vm8 = vcmask 132096  }
 0x46c   :  { %v1009_v1 = vpop.f32.mrb[2].mxu1 }
 0x46d   :  { %v1010_v63 = vpop.f32.mrb[3].mxu1 }
 0x46e   :  { %v1011_v45 = vadd.f32 %v1010_v63, %v1009_v1 }
 0x470   :  { %v891_v2 = vadd.f32 %v1011_v45, %v1575_v59 }
 0x472   :  { %895 = vst.msk [vmem:[%s1833_s16] sm:$0x3] %vm894_vm8, %v891_v2 }
 0x473   :  { %1271 = dma.done.wait [#allocation5], 32  }
 0x474   :  { %1272 = vsyncadd [#allocation5], 4294967264 }
 0x475   :  { %921 = vsyncpa [#allocation5], 1 }

</bundles_post_ra>
